<compile_context>
chip_gen: v7x
topology: tpu7x:2x2x1
jax: 0.10.0
libtpu: 0.0.40
codegen_flags: <defaults>
</compile_context>

<pallas_src>
import jax
import jax.numpy as jnp
from jax.experimental import pallas as pl
from jax.experimental.pallas import tpu as pltpu


def _round_up(n, m):
    return ((n + m - 1) // m) * m


def _choose_l_tile(Lp, bytes_per_row, budget, cap):
    """Largest L-tile <= cap that divides Lp and keeps one input block <= budget."""
    t = min(Lp, cap)
    while t > 1 and (Lp % t != 0 or t * bytes_per_row > budget):
        t -= 1
    return max(t, 1)


# -----------------------------------------------------------------------------
# Kernel A: weighted layer-sum (VPU) + Linear proj + layer-0 LSTM input gates.
# Reads batch-major SSL features, writes TIME-MAJOR bf16 gates for both
# directions in one pass (no x round trip, no XLA transpose).
# -----------------------------------------------------------------------------
def _wsum_proj_gates_kernel(wsm_ref, x_ref, pw_ref, pb_ref, wih_ref, bih_ref,
                            gx_ref):
    # wsm_ref : (K,) f32 in SMEM          softmaxed layer weights
    # x_ref   : (B, tl, K, Din) f32       SSL features (batch-major)
    # pw_ref  : (Din, Dout) bf16          projection weight
    # pb_ref  : (1, Dout) f32             projection bias
    # wih_ref : (Dout, 8H) bf16           [W_ih_fwd | W_ih_rev]
    # bih_ref : (1, 8H) f32               [b_fwd | b_rev] (b_ih + b_hh folded)
    # gx_ref  : (2, tl, B, 4H) bf16       time-major per-direction input gates
    B, tl, K, Din = x_ref.shape
    H4 = gx_ref.shape[-1]

    # K-layer weighted sum on the VPU (scalar weights from SMEM, free under MXU).
    ws = wsm_ref[0] * x_ref[:, :, 0, :]
    for k in range(1, K):
        ws = ws + wsm_ref[k] * x_ref[:, :, k, :]            # (B, tl, Din) f32

    rows = ws.reshape(B * tl, Din).astype(jnp.bfloat16)
    x = jnp.dot(rows, pw_ref[...], preferred_element_type=jnp.float32)
    x = x + pb_ref[...]                                     # (B*tl, Dout) f32
    g = jnp.dot(x.astype(jnp.bfloat16), wih_ref[...],
                preferred_element_type=jnp.float32)
    g = (g + bih_ref[...]).astype(gx_ref.dtype)             # (B*tl, 8H) bf16

    # batch-major -> time-major: per-batch strided stores (outside the serial
    # recurrence, overlapped by the pipeline).
    for b in range(B):
        gb = g[b * tl:(b + 1) * tl, :]
        gx_ref[0, :, b, :] = gb[:, :H4]
        gx_ref[1, :, b, :] = gb[:, H4:]


def _wsum_proj_gates(repr_p, w_sm, proj_w, proj_b, wih_cat, bih_cat, *, l_tile):
    B, Lp, K, Din = repr_p.shape
    Dout = proj_w.shape[1]
    G8 = wih_cat.shape[1]
    H4 = G8 // 2

    flops = 2 * Lp * B * (K * Din + Din * Dout + Dout * G8)
    bytes_acc = int(repr_p.size * 4 + 2 * Lp * B * H4 * 2
                    + proj_w.size * 2 + wih_cat.size * 2 + Dout * 4 + G8 * 4)

    return pl.pallas_call(
        _wsum_proj_gates_kernel,
        out_shape=jax.ShapeDtypeStruct((2, Lp, B, H4), jnp.bfloat16),
        grid=(Lp // l_tile,),
        in_specs=[
            pl.BlockSpec(memory_space=pltpu.MemorySpace.SMEM),          # w_sm
            pl.BlockSpec((B, l_tile, K, Din), lambda l: (0, l, 0, 0)),  # repr
            pl.BlockSpec((Din, Dout), lambda l: (0, 0)),                # proj_w
            pl.BlockSpec((1, Dout), lambda l: (0, 0)),                  # proj_b
            pl.BlockSpec((Dout, G8), lambda l: (0, 0)),                 # W_ih cat
            pl.BlockSpec((1, G8), lambda l: (0, 0)),                    # bias cat
        ],
        out_specs=pl.BlockSpec((2, l_tile, B, H4), lambda l: (0, l, 0, 0)),
        compiler_params=pltpu.CompilerParams(dimension_semantics=("parallel",)),
        cost_estimate=pl.CostEstimate(flops=int(flops), transcendentals=0,
                                      bytes_accessed=bytes_acc),
    )(w_sm, repr_p, proj_w, proj_b, wih_cat, bih_cat)


# -----------------------------------------------------------------------------
# Kernel B: layer-1 input gates from the (stacked) layer-0 bidirectional
# outputs.  concat([y_f, y_r]) @ W_ih realized as split-row matmuls; both
# directions' gates produced in one pass (y streamed from HBM once).
# -----------------------------------------------------------------------------
def _bidir_gates_kernel(y_ref, wf_ref, wr_ref, b_ref, gx_ref):
    # y_ref  : (2, tl, B, H) bf16   dir0 = forward outputs, dir1 = reverse
    # wf_ref : (H, 8H) bf16         rows of [W_ih_fwd | W_ih_rev] fed by y_f
    # wr_ref : (H, 8H) bf16         rows fed by y_r
    # b_ref  : (1, 8H) f32
    # gx_ref : (2, tl, B, 4H) bf16
    _, tl, B, H = y_ref.shape
    H4 = gx_ref.shape[-1]

    yf = y_ref[0].reshape(tl * B, H)
    yr = y_ref[1].reshape(tl * B, H)
    g = jnp.dot(yf, wf_ref[...], preferred_element_type=jnp.float32)
    g = g + jnp.dot(yr, wr_ref[...], preferred_element_type=jnp.float32)
    g = (g + b_ref[...]).reshape(tl, B, 2 * H4).astype(gx_ref.dtype)

    gx_ref[0] = g[:, :, :H4]
    gx_ref[1] = g[:, :, H4:]


def _bidir_gates(y0, w_from_f, w_from_r, bih_cat, *, l_tile):
    _, Lp, B, H = y0.shape
    G8 = w_from_f.shape[1]
    H4 = G8 // 2

    flops = 2 * Lp * B * 2 * H * G8
    bytes_acc = int(y0.size * 2 + 2 * Lp * B * H4 * 2
                    + (w_from_f.size + w_from_r.size) * 2 + G8 * 4)

    return pl.pallas_call(
        _bidir_gates_kernel,
        out_shape=jax.ShapeDtypeStruct((2, Lp, B, H4), jnp.bfloat16),
        grid=(Lp // l_tile,),
        in_specs=[
            pl.BlockSpec((2, l_tile, B, H), lambda l: (0, l, 0, 0)),
            pl.BlockSpec((H, G8), lambda l: (0, 0)),
            pl.BlockSpec((H, G8), lambda l: (0, 0)),
            pl.BlockSpec((1, G8), lambda l: (0, 0)),
        ],
        out_specs=pl.BlockSpec((2, l_tile, B, H4), lambda l: (0, l, 0, 0)),
        compiler_params=pltpu.CompilerParams(dimension_semantics=("parallel",)),
        cost_estimate=pl.CostEstimate(flops=int(flops), transcendentals=0,
                                      bytes_accessed=bytes_acc),
    )(y0, w_from_f, w_from_r, bih_cat)


# -----------------------------------------------------------------------------
# Kernel C: LSTM recurrence.  grid = (direction, time-chunk); direction is
# "parallel" (two TensorCores on v7x), the time axis is "arbitrary" and carries
# (h, c) in VMEM scratch.  Packed-sequence padding is emulated with per-step
# validity masks; chunks that are fully valid for every sequence take a fast
# path with no masking work at all.
# -----------------------------------------------------------------------------
def _make_bilstm_dir_kernel(Tc, H, unroll):
    def kernel(sched_ref, len_ref, gx_ref, whh_ref, y_ref, h_sc, c_sc):
        d = pl.program_id(0)            # 0 = forward, 1 = reverse
        c = pl.program_id(1)
        nc = pl.num_programs(1)

        @pl.when(c == 0)
        def _():
            h_sc[...] = jnp.zeros_like(h_sc)
            c_sc[...] = jnp.zeros_like(c_sc)

        whh = whh_ref[...]              # (H, 4H) bf16 (pre-cast in wrapper)
        lens = len_ref[...]             # (B, 1) int32
        min_len = sched_ref[0]          # scalar int32 from SMEM

        chunk = c + d * (nc - 1 - 2 * c)          # fwd: c ; rev: nc-1-c
        t0 = chunk * Tc

        def cell(gx, h_prev, c_prev):
            # PyTorch gate order [i, f, g, o]; b_ih + b_hh already folded in gx.
            g = gx.astype(jnp.float32) + jnp.dot(
                h_prev.astype(jnp.bfloat16), whh,
                preferred_element_type=jnp.float32)
            i = jax.nn.sigmoid(g[:, 0 * H:1 * H])
            f = jax.nn.sigmoid(g[:, 1 * H:2 * H])
            gg = jnp.tanh(g[:, 2 * H:3 * H])
            o = jax.nn.sigmoid(g[:, 3 * H:4 * H])
            c_new = f * c_prev + i * gg
            h_new = o * jnp.tanh(c_new)
            return h_new, c_new

        def step_fast(idx, carry):
            s = idx + d * (Tc - 1 - 2 * idx)      # fwd ascending / rev descending
            h_new, c_new = cell(gx_ref[s], h_sc[...], c_sc[...])
            h_sc[...] = h_new
            c_sc[...] = c_new
            y_ref[s] = h_new.astype(y_ref.dtype)
            return carry

        def step_masked(idx, carry):
            s = idx + d * (Tc - 1 - 2 * idx)
            h_prev, c_prev = h_sc[...], c_sc[...]
            h_new, c_new = cell(gx_ref[s], h_prev, c_prev)
            valid = (t0 + s) < lens               # (B, 1) bool
            h_sc[...] = jnp.where(valid, h_new, h_prev)
            c_sc[...] = jnp.where(valid, c_new, c_prev)
            y_ref[s] = jnp.where(valid, h_new, 0.0).astype(y_ref.dtype)
            return carry

        fully_valid = (t0 + Tc) <= min_len

        @pl.when(fully_valid)
        def _():
            jax.lax.fori_loop(0, Tc, step_fast, 0, unroll=unroll)

        @pl.when(jnp.logical_not(fully_valid))
        def _():
            jax.lax.fori_loop(0, Tc, step_masked, 0, unroll=unroll)

    return kernel


def _bilstm_layer(gx, whh2, lens_2d, sched, *, Tc, out_dtype, unroll):
    _, Lp, B, G4 = gx.shape
    H = G4 // 4
    nc = Lp // Tc

    flops = 2 * Lp * B * 2 * H * G4
    transcend = 2 * Lp * B * 5 * H
    out_bytes = 2 * Lp * B * H * jnp.dtype(out_dtype).itemsize
    bytes_acc = int(gx.size * 2 + out_bytes + whh2.size * 2 + B * 4)

    return pl.pallas_call(
        _make_bilstm_dir_kernel(Tc, H, unroll),
        out_shape=jax.ShapeDtypeStruct((2, Lp, B, H), out_dtype),
        grid=(2, nc),
        in_specs=[
            pl.BlockSpec(memory_space=pltpu.MemorySpace.SMEM),   # [min_len]
            pl.BlockSpec((B, 1), lambda d, c: (0, 0)),           # lengths
            pl.BlockSpec((None, Tc, B, G4),
                         lambda d, c: (d, c + d * (nc - 1 - 2 * c), 0, 0)),
            pl.BlockSpec((None, H, G4), lambda d, c: (d, 0, 0)),
        ],
        out_specs=pl.BlockSpec((None, Tc, B, H),
                               lambda d, c: (d, c + d * (nc - 1 - 2 * c), 0, 0)),
        scratch_shapes=[pltpu.VMEM((B, H), jnp.float32),
                        pltpu.VMEM((B, H), jnp.float32)],
        compiler_params=pltpu.CompilerParams(
            dimension_semantics=("parallel", "arbitrary")),
        cost_estimate=pl.CostEstimate(flops=int(flops),
                                      transcendentals=int(transcend),
                                      bytes_accessed=bytes_acc),
    )(sched, lens_2d, gx, whh2)


# -----------------------------------------------------------------------------
# Full module forward
# -----------------------------------------------------------------------------
def bilstm_downstream(repr_blkd, lengths, params, *, time_chunk=32,
                      proj_vmem_budget=6 * 1024 * 1024):
    """repr_blkd: (B, L, n_layers, d_in) f32; lengths: (B,) int.
    Returns (B, L, d_out) f32, matching BiLSTMDownstream.forward."""
    B, L, K, Din = repr_blkd.shape
    Dout = params["proj_w"].shape[1]
    H = Dout // 2

    Tc = min(time_chunk, L)
    Lp = _round_up(L, Tc)
    if Lp != L:
        repr_blkd = jnp.pad(repr_blkd, ((0, 0), (0, Lp - L), (0, 0), (0, 0)))
    unroll = True if Tc <= 32 else 8

    # ---- fold / pre-cast weights once (bf16 matmul operands, f32 bias/state).
    w_sm = jax.nn.softmax(params["weight_raw"]).astype(jnp.float32)
    proj_w = params["proj_w"].astype(jnp.bfloat16)
    proj_b = params["proj_b"].reshape(1, Dout).astype(jnp.float32)

    wih0_cat = jnp.concatenate([params["wih_0_f"], params["wih_0_r"]],
                               axis=1).astype(jnp.bfloat16)           # (Dout, 8H)
    bih0_cat = jnp.concatenate([params["b_0_f"], params["b_0_r"]], axis=1)
    whh0 = jnp.stack([params["whh_0_f"], params["whh_0_r"]]).astype(jnp.bfloat16)

    w1_from_f = jnp.concatenate([params["wih_1_f"][:H], params["wih_1_r"][:H]],
                                axis=1).astype(jnp.bfloat16)          # (H, 8H)
    w1_from_r = jnp.concatenate([params["wih_1_f"][H:], params["wih_1_r"][H:]],
                                axis=1).astype(jnp.bfloat16)          # (H, 8H)
    bih1_cat = jnp.concatenate([params["b_1_f"], params["b_1_r"]], axis=1)
    whh1 = jnp.stack([params["whh_1_f"], params["whh_1_r"]]).astype(jnp.bfloat16)

    lens_2d = lengths.reshape(B, 1).astype(jnp.int32)
    sched = jnp.min(lengths).astype(jnp.int32).reshape(1)

    # ---- stage A: weighted-sum (VPU) + proj + layer-0 input gates, time-major.
    tlA = _choose_l_tile(Lp, B * K * Din * 4, proj_vmem_budget, cap=128)
    gx0 = _wsum_proj_gates(repr_blkd, w_sm, proj_w, proj_b, wih0_cat, bih0_cat,
                           l_tile=tlA)                                # (2,Lp,B,4H)

    # ---- layer-0 recurrence (bf16 outputs, only consumed by layer-1 gates).
    y0 = _bilstm_layer(gx0, whh0, lens_2d, sched, Tc=Tc,
                       out_dtype=jnp.bfloat16, unroll=unroll)         # (2,Lp,B,H)

    # ---- layer-1 input gates from the bidirectional layer-0 outputs.
    tlB = _choose_l_tile(Lp, 2 * B * H * 2 + 2 * B * 4 * H * 2,
                         proj_vmem_budget, cap=512)
    gx1 = _bidir_gates(y0, w1_from_f, w1_from_r, bih1_cat, l_tile=tlB)

    # ---- layer-1 recurrence (final outputs, f32).
    y1 = _bilstm_layer(gx1, whh1, lens_2d, sched, Tc=Tc,
                       out_dtype=jnp.float32, unroll=unroll)          # (2,Lp,B,H)

    # (2, Lp, B, H) -> (B, L, 2H): forward in [:H], reverse in [H:].
    out = jnp.transpose(y1[:, :L], (2, 1, 0, 3)).reshape(B, L, 2 * H)
    return out


# -----------------------------------------------------------------------------
# Pure-JAX f32 reference (true module semantics) for the self-check
# -----------------------------------------------------------------------------
def reference(repr_blkd, lengths, params):
    B, L, K, Din = repr_blkd.shape
    hp = jax.lax.Precision.HIGHEST
    w = jax.nn.softmax(params["weight_raw"])
    x = jnp.einsum("blkd,k->bld", repr_blkd, w, precision=hp)
    x = jnp.dot(x, params["proj_w"], precision=hp) + params["proj_b"]
    mask = (jnp.arange(L)[:, None] < lengths[None, :]).astype(jnp.float32)[:, :, None]

    def run_dir(xin_lbd, wih, whh, b, reverse):
        H = whh.shape[0]

        def step(carry, inputs):
            h, c = carry
            xt, mt = inputs
            gates = (jnp.dot(xt, wih, precision=hp)
                     + jnp.dot(h, whh, precision=hp) + b)
            i = jax.nn.sigmoid(gates[:, :H])
            f = jax.nn.sigmoid(gates[:, H:2 * H])
            g = jnp.tanh(gates[:, 2 * H:3 * H])
            o = jax.nn.sigmoid(gates[:, 3 * H:])
            cn = f * c + i * g
            hn = o * jnp.tanh(cn)
            return (jnp.where(mt > 0, hn, h), jnp.where(mt > 0, cn, c)), hn * mt

        xs, ms = (xin_lbd[::-1], mask[::-1]) if reverse else (xin_lbd, mask)
        init = (jnp.zeros((B, H), jnp.float32), jnp.zeros((B, H), jnp.float32))
        _, ys = jax.lax.scan(step, init, (xs, ms))
        return ys[::-1] if reverse else ys

    h = jnp.transpose(x, (1, 0, 2))
    for layer in range(2):
        fdir = run_dir(h, params[f"wih_{layer}_f"], params[f"whh_{layer}_f"],
                       params[f"b_{layer}_f"], False)
        rdir = run_dir(h, params[f"wih_{layer}_r"], params[f"whh_{layer}_r"],
                       params[f"b_{layer}_r"], True)
        h = jnp.concatenate([fdir, rdir], axis=-1)
    return jnp.transpose(h, (1, 0, 2))


# -----------------------------------------------------------------------------
def make_params(key, n_layers, upstream_dim, d_out):
    H = d_out // 2
    keys = jax.random.split(key, 32)
    ki = iter(keys)
    scale = 0.1
    params = {
        "weight_raw": jax.random.normal(next(ki), (n_layers,), jnp.float32),
        "proj_w": scale * jax.random.normal(next(ki), (upstream_dim, d_out), jnp.float32),
        "proj_b": scale * jax.random.normal(next(ki), (d_out,), jnp.float32),
    }
    for layer in range(2):
        din = d_out  # layer 0 input = d_out; layer 1 input = 2*H = d_out
        for tag in ("f", "r"):
            params[f"wih_{layer}_{tag}"] = scale * jax.random.normal(next(ki), (din, 4 * H), jnp.float32)
            params[f"whh_{layer}_{tag}"] = scale * jax.random.normal(next(ki), (H, 4 * H), jnp.float32)
            # b_ih + b_hh folded into a single bias, shaped (1, 4H)
            params[f"b_{layer}_{tag}"] = scale * jax.random.normal(next(ki), (1, 4 * H), jnp.float32)
    return params


if __name__ == "__main__":
    # NOTE: production sizing should keep H a multiple of 128 and B a multiple
    # of 8; demo shapes below are intentionally tiny (full-extent blocks).
    B, L, n_layers, d_in, d_out = 2, 8, 4, 32, 32

    key = jax.random.PRNGKey(0)
    k_repr, k_par = jax.random.split(key)
    repr_blkd = jax.random.normal(k_repr, (B, L, n_layers, d_in), jnp.float32)
    lengths = jnp.array([8, 5], dtype=jnp.int32)
    params = make_params(k_par, n_layers, d_in, d_out)

    # time_chunk=4 so both the fully-valid fast path and the masked tail path
    # of the recurrence kernel get exercised (min length = 5, L = 8).
    out = bilstm_downstream(repr_blkd, lengths, params, time_chunk=4)
    out = jax.block_until_ready(out)
    assert out.shape == (B, L, d_out), out.shape

    ref = jax.block_until_ready(reference(repr_blkd, lengths, params))
    # bf16 matmul operands + bf16 gx / layer-0 y streams (f32 accumulation).
    err = float(jnp.max(jnp.abs(out - ref)))
    assert jnp.allclose(out, ref, rtol=2e-2, atol=2e-2), err

    print("KERNEL_OK")
</pallas_src>

<mosaic_0001>
module attributes {stable_mosaic.version = 11 : i64} {
  func.func @_wsum_proj_gates_kernel(%arg0: i32, %arg1: memref<4xf32, #tpu.memory_space<smem>>, %arg2: memref<2x8x4x32xf32, #tpu.memory_space<vmem>>, %arg3: memref<32x32xbf16, #tpu.memory_space<vmem>>, %arg4: memref<1x32xf32, #tpu.memory_space<vmem>>, %arg5: memref<32x128xbf16, #tpu.memory_space<vmem>>, %arg6: memref<1x128xf32, #tpu.memory_space<vmem>>, %arg7: memref<2x8x2x64xbf16, #tpu.memory_space<vmem>>) attributes {dimension_semantics = [#tpu.dimension_semantics<parallel>], iteration_bounds = array<i64: 1>, scalar_prefetch = 0 : i64, scratch_operands = 0 : i64, tpu.core_type = #tpu.core_type<tc>, window_params = [{transform_indices = @transform_0, window_bounds = array<i64: 4>}, {transform_indices = @transform_1, window_bounds = array<i64: 2, 8, 4, 32>}, {pipeline_mode = #tpu.pipeline_mode<synchronous>, transform_indices = @transform_2, window_bounds = array<i64: 32, 32>}, {pipeline_mode = #tpu.pipeline_mode<synchronous>, transform_indices = @transform_3, window_bounds = array<i64: 1, 32>}, {pipeline_mode = #tpu.pipeline_mode<synchronous>, transform_indices = @transform_4, window_bounds = array<i64: 32, 128>}, {pipeline_mode = #tpu.pipeline_mode<synchronous>, transform_indices = @transform_5, window_bounds = array<i64: 1, 128>}, {transform_indices = @transform_6, window_bounds = array<i64: 2, 8, 2, 64>}]} {
    %c0 = arith.constant 0 : index
    %0 = memref.load %arg1[%c0] : memref<4xf32, #tpu.memory_space<smem>>
    %c0_0 = arith.constant 0 : index
    %c0_1 = arith.constant 0 : index
    %c0_2 = arith.constant 0 : index
    %c0_3 = arith.constant 0 : index
    %1 = vector.load %arg2[%c0_0, %c0_1, %c0_2, %c0_3] : memref<2x8x4x32xf32, #tpu.memory_space<vmem>>, vector<2x8x1x32xf32>
    %2 = vector.shape_cast %1 : vector<2x8x1x32xf32> to vector<2x8x32xf32>
    %3 = vector.broadcast %0 : f32 to vector<2x8x32xf32>
    %4 = arith.mulf %3, %2 : vector<2x8x32xf32>
    %c1 = arith.constant 1 : index
    %5 = memref.load %arg1[%c1] : memref<4xf32, #tpu.memory_space<smem>>
    %c0_4 = arith.constant 0 : index
    %c0_5 = arith.constant 0 : index
    %c1_6 = arith.constant 1 : index
    %c0_7 = arith.constant 0 : index
    %6 = vector.load %arg2[%c0_4, %c0_5, %c1_6, %c0_7] : memref<2x8x4x32xf32, #tpu.memory_space<vmem>>, vector<2x8x1x32xf32>
    %7 = vector.shape_cast %6 : vector<2x8x1x32xf32> to vector<2x8x32xf32>
    %8 = vector.broadcast %5 : f32 to vector<2x8x32xf32>
    %9 = arith.mulf %8, %7 : vector<2x8x32xf32>
    %10 = arith.addf %4, %9 : vector<2x8x32xf32>
    %c2 = arith.constant 2 : index
    %11 = memref.load %arg1[%c2] : memref<4xf32, #tpu.memory_space<smem>>
    %c0_8 = arith.constant 0 : index
    %c0_9 = arith.constant 0 : index
    %c2_10 = arith.constant 2 : index
    %c0_11 = arith.constant 0 : index
    %12 = vector.load %arg2[%c0_8, %c0_9, %c2_10, %c0_11] : memref<2x8x4x32xf32, #tpu.memory_space<vmem>>, vector<2x8x1x32xf32>
    %13 = vector.shape_cast %12 : vector<2x8x1x32xf32> to vector<2x8x32xf32>
    %14 = vector.broadcast %11 : f32 to vector<2x8x32xf32>
    %15 = arith.mulf %14, %13 : vector<2x8x32xf32>
    %16 = arith.addf %10, %15 : vector<2x8x32xf32>
    %c3 = arith.constant 3 : index
    %17 = memref.load %arg1[%c3] : memref<4xf32, #tpu.memory_space<smem>>
    %c0_12 = arith.constant 0 : index
    %c0_13 = arith.constant 0 : index
    %c3_14 = arith.constant 3 : index
    %c0_15 = arith.constant 0 : index
    %18 = vector.load %arg2[%c0_12, %c0_13, %c3_14, %c0_15] : memref<2x8x4x32xf32, #tpu.memory_space<vmem>>, vector<2x8x1x32xf32>
    %19 = vector.shape_cast %18 : vector<2x8x1x32xf32> to vector<2x8x32xf32>
    %20 = vector.broadcast %17 : f32 to vector<2x8x32xf32>
    %21 = arith.mulf %20, %19 : vector<2x8x32xf32>
    %22 = arith.addf %16, %21 : vector<2x8x32xf32>
    %23 = vector.shape_cast %22 : vector<2x8x32xf32> to vector<16x32xf32>
    %24 = arith.truncf %23 : vector<16x32xf32> to vector<16x32xbf16>
    %c0_16 = arith.constant 0 : index
    %c0_17 = arith.constant 0 : index
    %25 = vector.load %arg3[%c0_16, %c0_17] : memref<32x32xbf16, #tpu.memory_space<vmem>>, vector<32x32xbf16>
    %cst = arith.constant dense<0.000000e+00> : vector<16x32xf32>
    %26 = tpu.matmul %24, %25, %cst {dimension_numbers = #tpu.dot_dimension_numbers<[1], [0], [0], [1], [0, 0, 1, 1], [], []>} : vector<16x32xbf16>, vector<32x32xbf16>, vector<16x32xf32> -> vector<16x32xf32>
    %c0_18 = arith.constant 0 : index
    %c0_19 = arith.constant 0 : index
    %27 = vector.load %arg4[%c0_18, %c0_19] : memref<1x32xf32, #tpu.memory_space<vmem>>, vector<1x32xf32>
    %28 = vector.broadcast %27 : vector<1x32xf32> to vector<16x32xf32>
    %29 = arith.addf %26, %28 : vector<16x32xf32>
    %30 = arith.truncf %29 : vector<16x32xf32> to vector<16x32xbf16>
    %c0_20 = arith.constant 0 : index
    %c0_21 = arith.constant 0 : index
    %31 = vector.load %arg5[%c0_20, %c0_21] : memref<32x128xbf16, #tpu.memory_space<vmem>>, vector<32x128xbf16>
    %cst_22 = arith.constant dense<0.000000e+00> : vector<16x128xf32>
    %32 = tpu.matmul %30, %31, %cst_22 {dimension_numbers = #tpu.dot_dimension_numbers<[1], [0], [0], [1], [0, 0, 1, 1], [], []>} : vector<16x32xbf16>, vector<32x128xbf16>, vector<16x128xf32> -> vector<16x128xf32>
    %c0_23 = arith.constant 0 : index
    %c0_24 = arith.constant 0 : index
    %33 = vector.load %arg6[%c0_23, %c0_24] : memref<1x128xf32, #tpu.memory_space<vmem>>, vector<1x128xf32>
    %34 = vector.broadcast %33 : vector<1x128xf32> to vector<16x128xf32>
    %35 = arith.addf %32, %34 : vector<16x128xf32>
    %36 = arith.truncf %35 : vector<16x128xf32> to vector<16x128xbf16>
    %37 = vector.extract_strided_slice %36 {offsets = [0, 0], sizes = [8, 128], strides = [1, 1]} : vector<16x128xbf16> to vector<8x128xbf16>
    %38 = vector.extract_strided_slice %37 {offsets = [0, 0], sizes = [8, 64], strides = [1, 1]} : vector<8x128xbf16> to vector<8x64xbf16>
    %c0_25 = arith.constant 0 : index
    %c0_26 = arith.constant 0 : index
    %c0_27 = arith.constant 0 : index
    %c0_28 = arith.constant 0 : index
    %39 = vector.load %arg7[%c0_25, %c0_26, %c0_27, %c0_28] : memref<2x8x2x64xbf16, #tpu.memory_space<vmem>>, vector<1x8x1x64xbf16>
    %40 = vector.shape_cast %39 : vector<1x8x1x64xbf16> to vector<8x64xbf16>
    %41 = vector.shape_cast %38 : vector<8x64xbf16> to vector<1x8x1x64xbf16>
    tpu.vector_store %arg7[%c0_25, %c0_26, %c0_27, %c0_28], %41 {strides = array<i32>} : memref<2x8x2x64xbf16, #tpu.memory_space<vmem>>, vector<1x8x1x64xbf16>,
    %42 = vector.extract_strided_slice %37 {offsets = [0, 64], sizes = [8, 64], strides = [1, 1]} : vector<8x128xbf16> to vector<8x64xbf16>
    %c1_29 = arith.constant 1 : index
    %c0_30 = arith.constant 0 : index
    %c0_31 = arith.constant 0 : index
    %c0_32 = arith.constant 0 : index
    %43 = vector.load %arg7[%c1_29, %c0_30, %c0_31, %c0_32] : memref<2x8x2x64xbf16, #tpu.memory_space<vmem>>, vector<1x8x1x64xbf16>
    %44 = vector.shape_cast %43 : vector<1x8x1x64xbf16> to vector<8x64xbf16>
    %45 = vector.shape_cast %42 : vector<8x64xbf16> to vector<1x8x1x64xbf16>
    tpu.vector_store %arg7[%c1_29, %c0_30, %c0_31, %c0_32], %45 {strides = array<i32>} : memref<2x8x2x64xbf16, #tpu.memory_space<vmem>>, vector<1x8x1x64xbf16>,
    %46 = vector.extract_strided_slice %36 {offsets = [8, 0], sizes = [8, 128], strides = [1, 1]} : vector<16x128xbf16> to vector<8x128xbf16>
    %47 = vector.extract_strided_slice %46 {offsets = [0, 0], sizes = [8, 64], strides = [1, 1]} : vector<8x128xbf16> to vector<8x64xbf16>
    %c0_33 = arith.constant 0 : index
    %c0_34 = arith.constant 0 : index
    %c1_35 = arith.constant 1 : index
    %c0_36 = arith.constant 0 : index
    %48 = vector.load %arg7[%c0_33, %c0_34, %c1_35, %c0_36] : memref<2x8x2x64xbf16, #tpu.memory_space<vmem>>, vector<1x8x1x64xbf16>
    %49 = vector.shape_cast %48 : vector<1x8x1x64xbf16> to vector<8x64xbf16>
    %50 = vector.shape_cast %47 : vector<8x64xbf16> to vector<1x8x1x64xbf16>
    tpu.vector_store %arg7[%c0_33, %c0_34, %c1_35, %c0_36], %50 {strides = array<i32>} : memref<2x8x2x64xbf16, #tpu.memory_space<vmem>>, vector<1x8x1x64xbf16>,
    %51 = vector.extract_strided_slice %46 {offsets = [0, 64], sizes = [8, 64], strides = [1, 1]} : vector<8x128xbf16> to vector<8x64xbf16>
    %c1_37 = arith.constant 1 : index
    %c0_38 = arith.constant 0 : index
    %c1_39 = arith.constant 1 : index
    %c0_40 = arith.constant 0 : index
    %52 = vector.load %arg7[%c1_37, %c0_38, %c1_39, %c0_40] : memref<2x8x2x64xbf16, #tpu.memory_space<vmem>>, vector<1x8x1x64xbf16>
    %53 = vector.shape_cast %52 : vector<1x8x1x64xbf16> to vector<8x64xbf16>
    %54 = vector.shape_cast %51 : vector<8x64xbf16> to vector<1x8x1x64xbf16>
    tpu.vector_store %arg7[%c1_37, %c0_38, %c1_39, %c0_40], %54 {strides = array<i32>} : memref<2x8x2x64xbf16, #tpu.memory_space<vmem>>, vector<1x8x1x64xbf16>,
    return
  }
  func.func @transform_0(%arg0: i32) -> i32 {
    %c0_i32 = arith.constant 0 : i32
    %c0_i32_0 = arith.constant 0 : i32
    return %c0_i32 : i32
  }
  func.func @transform_1(%arg0: i32) -> (i32, i32, i32, i32) {
    %c0_i32 = arith.constant 0 : i32
    %c0_i32_0 = arith.constant 0 : i32
    %c0_i32_1 = arith.constant 0 : i32
    %c0_i32_2 = arith.constant 0 : i32
    return %c0_i32, %arg0, %c0_i32_0, %c0_i32_1 : i32, i32, i32, i32
  }
  func.func @transform_2(%arg0: i32) -> (i32, i32) {
    %c0_i32 = arith.constant 0 : i32
    %c0_i32_0 = arith.constant 0 : i32
    %c0_i32_1 = arith.constant 0 : i32
    return %c0_i32, %c0_i32_0 : i32, i32
  }
  func.func @transform_3(%arg0: i32) -> (i32, i32) {
    %c0_i32 = arith.constant 0 : i32
    %c0_i32_0 = arith.constant 0 : i32
    %c0_i32_1 = arith.constant 0 : i32
    return %c0_i32, %c0_i32_0 : i32, i32
  }
  func.func @transform_4(%arg0: i32) -> (i32, i32) {
    %c0_i32 = arith.constant 0 : i32
    %c0_i32_0 = arith.constant 0 : i32
    %c0_i32_1 = arith.constant 0 : i32
    return %c0_i32, %c0_i32_0 : i32, i32
  }
  func.func @transform_5(%arg0: i32) -> (i32, i32) {
    %c0_i32 = arith.constant 0 : i32
    %c0_i32_0 = arith.constant 0 : i32
    %c0_i32_1 = arith.constant 0 : i32
    return %c0_i32, %c0_i32_0 : i32, i32
  }
  func.func @transform_6(%arg0: i32) -> (i32, i32, i32, i32) {
    %c0_i32 = arith.constant 0 : i32
    %c0_i32_0 = arith.constant 0 : i32
    %c0_i32_1 = arith.constant 0 : i32
    %c0_i32_2 = arith.constant 0 : i32
    return %c0_i32, %arg0, %c0_i32_0, %c0_i32_1 : i32, i32, i32, i32
  }
}

</mosaic_0001>

<bundles_post_ra>
// kernel: tpu_custom_call.1
= control target key start
LH: loop header
LB: loop body
LE: loop exit
PB: predicated region body
PF: predicated region fallthrough
CT: control target
= control target key end

     0   :  { %11 = vsyncpa [#allocation5], 0  ;;  %s1152_s0 = inlined_call_operand.hbm [shape: f32[4], index: 0, kind: input, shape index: {}]   ;;  %s1153_s1 = inlined_call_operand.hbm [shape: f32[2,8,4,32], index: 1, kind: input, shape index: {}]   ;;  %s1154_s2 = inlined_call_operand.hbm [shape: bf16[32,32], index: 2, kind: input, shape index: {}]   ;;  %s1155_s3 = inlined_call_operand.vmem [shape: f32[1,32], index: 3, kind: input, shape index: {}]   ;;  %s1156_s4 = inlined_call_operand.hbm [shape: bf16[32,128], index: 4, kind: input, shape index: {}]   ;;  %s1157_s5 = inlined_call_operand.vmem [shape: f32[1,128], index: 5, kind: input, shape index: {}]   ;;  %s1158_s6 = inlined_call_operand.hbm [shape: bf16[2,8,2,64], index: 6, kind: output, shape index: {}]  }
   0x1   :  { %12 = vsyncpa [#allocation3], 0 }
   0x2   :  { %13 = vsyncpa [#allocation8], 0 }
   0x3   :  { %14 = vsyncpa [#allocation4], 0  ;;  %s913_s21 = smov [#allocation7]   ;;  %s914_s23 = smov [#allocation6]  }
   0x4   :  { %s40_s22 = sshll.u32 %s913_s21, 4  ;;  %s28_s24 = sshll.u32 %s914_s23, 4  ;;  %s41_s22 = int_to_ptr.vmem [resolvable:$true] %s40_s22  ;;  %s29_s24 = int_to_ptr.vmem [resolvable:$true] %s28_s24 }
   0x5   :  { %s807_s27 = scalar_lea.hbm %s1154_s2, 256 }
   0x6   :  { %p808_p0 = scmp.ne.s32.totalorder %s1154_s2, %s807_s27  ;;  %p811_p1 = scmp.lt.u32.totalorder %s807_s27, %s1154_s2 }
   0x8   :  { %p813_p2 = pnand %p811_p1, %p808_p0 }
   0xa   :  { %816 = shalt.err (!%p813_p2)
}
   0xb   :  { %s817_s8 = scalar_lea.vmem %s41_s22, 256  ;;  %p822_p4 = scmp.lt.s32.totalorder %s41_s22, %s41_s22 }
   0xc   :  { %p818_p3 = scmp.ne.s32.totalorder %s41_s22, %s817_s8  ;;  %p823_p5 = scmp.lt.s32.totalorder %s817_s8, %s817_s8 }
   0xe   :  { %p824_p6 = por %p823_p5, %p822_p4 }
  0x10   :  { %p825_p7 = pnand %p824_p6, %p818_p3 }
  0x12   :  { %828 = shalt.err (!%p825_p7)
}
  0x13   :  { %s915_s9 = smov 64   ;;  %s916_s10 = smov 4  }
  0x14   :  { %46 = dma.hbm_to_vmem [thread:$0]  %s1154_s2, 256, %s41_s22, [#allocation8], %s915_s9, %s915_s9, %s916_s10  }
  0x15   :  { %s829_s15 = scalar_lea.hbm %s1152_s0, 16 }
  0x16   :  { %p830_p8 = scmp.ne.s32.totalorder %s1152_s0, %s829_s15  ;;  %p833_p9 = scmp.lt.u32.totalorder %s829_s15, %s1152_s0 }
  0x18   :  { %p835_p10 = pnand %p833_p9, %p830_p8 }
  0x1a   :  { %838 = shalt.err (!%p835_p10)
}
  0x1b   :  { %s917_s20 = smov [#allocation2]   ;;  %s839_s25 = scalar_lea.hbm %s1153_s1, 1024 }
  0x1c   :  { %22 = dma.hbm_to_smem %s1152_s0, 16, %s917_s20, [#allocation5]  }
  0x1d   :  { %p840_p11 = scmp.ne.s32.totalorder %s1153_s1, %s839_s25  ;;  %p843_p12 = scmp.lt.u32.totalorder %s839_s25, %s1153_s1 }
  0x1f   :  { %p845_p13 = pnand %p843_p12, %p840_p11 }
  0x21   :  { %848 = shalt.err (!%p845_p13)
}
  0x22   :  { %s849_s30 = scalar_lea.vmem %s29_s24, 1024  ;;  %p854_p1 = scmp.lt.s32.totalorder %s29_s24, %s29_s24 }
  0x23   :  { %p850_p0 = scmp.ne.s32.totalorder %s29_s24, %s849_s30  ;;  %p855_p2 = scmp.lt.s32.totalorder %s849_s30, %s849_s30 }
  0x25   :  { %p856_p3 = por %p855_p2, %p854_p1 }
  0x27   :  { %p857_p4 = pnand %p856_p3, %p850_p0 }
  0x29   :  { %860 = shalt.err (!%p857_p4)
}
  0x2a   :  { %34 = dma.hbm_to_vmem [thread:$0]  %s1153_s1, 1024, %s29_s24, [#allocation3], %s915_s9, %s915_s9, %s916_s10  }
  0x2b   :  { %s918_s8 = smov [#allocation9]   ;;  %s861_s14 = scalar_lea.hbm %s1156_s4, 256 }
  0x2c   :  { %s54_s11 = sshll.u32 %s918_s8, 4  ;;  %p862_p5 = scmp.ne.s32.totalorder %s1156_s4, %s861_s14  ;;  %s55_s11 = int_to_ptr.vmem [resolvable:$true] %s54_s11 }
  0x2d   :  { %p865_p6 = scmp.lt.u32.totalorder %s861_s14, %s1156_s4 }
  0x2f   :  { %p867_p7 = pnand %p865_p6, %p862_p5 }
  0x31   :  { %870 = shalt.err (!%p867_p7)
}
  0x32   :  { %s871_s19 = scalar_lea.vmem %s55_s11, 256  ;;  %p876_p9 = scmp.lt.s32.totalorder %s55_s11, %s55_s11 }
  0x33   :  { %p872_p8 = scmp.ne.s32.totalorder %s55_s11, %s871_s19  ;;  %p877_p10 = scmp.lt.s32.totalorder %s871_s19, %s871_s19 }
  0x35   :  { %p878_p11 = por %p877_p10, %p876_p9 }
  0x37   :  { %p879_p12 = pnand %p878_p11, %p872_p8 }
  0x39   :  { %882 = shalt.err (!%p879_p12)
}
  0x3a   :  { %60 = dma.hbm_to_vmem [thread:$0]  %s1156_s4, 256, %s55_s11, [#allocation8], %s915_s9, %s915_s9, %s916_s10  }
  0x3b   :  { %905 = dma.done.wait [#allocation5], 16  }
  0x3c   :  { %906 = vsyncadd [#allocation5], 4294967280 }
  0x3d   :  { %907 = dma.done.wait [#allocation3], 1024  }
  0x3e   :  { %908 = vsyncadd [#allocation3], 4294966272 }
  0x3f   :  { %909 = dma.done.wait [#allocation8], 512  }
  0x40   :  { %910 = vsyncadd [#allocation8], 4294966784 }
  0x41   :  { %75 = sfence }
  0x42   :  { %v803_v0 = vld [vmem:[#allocation7] sm:$0xff]   ;;  %v919_v1 = vmov 0.0   ;;  %v804_v2 = vld [vmem:[#allocation7 + $0x8] sm:$0xff]   ;;  %vm920_vm0 = vmmov 0   ;;  %s77_s20 = sld [smem:[#allocation2]]  ;;  %s749_s4 = sld [smem:[#allocation2 + $0x1]] }
  0x43   :  { %775 = vmatprep.subr.bf16.mxu0 %v919_v1  ;;  %783 = vmatprep.subr.bf16.mxu1 %v919_v1  ;;  %v78_v3 = vld [vmem:[#allocation6] sm:$0x1]  ;;  %v79_v4 = vld [vmem:[#allocation6 + $0x4] sm:$0x1]  ;;  %v80_v5 = vld [vmem:[#allocation6 + $0x8] sm:$0x1] }
  0x44   :  { %776 = vmatpush3.bf16.msra.mxu0 %v803_v0  ;;  %779 = vmatprep.mubr.msk.bf16.mxu0 %vm920_vm0, %v919_v1  ;;  %v81_v6 = vld [vmem:[#allocation6 + $0xc] sm:$0x1]  ;;  %v82_v7 = vld [vmem:[#allocation6 + $0x10] sm:$0x1]  ;;  %v83_v8 = vld [vmem:[#allocation6 + $0x14] sm:$0x1] }
  0x45   :  { %777 = vmatprep.subr.bf16.mxu0 %v919_v1  ;;  %787 = vmatprep.mubr.msk.bf16.mxu1 %vm920_vm0, %v919_v1  ;;  %v84_v9 = vld [vmem:[#allocation6 + $0x18] sm:$0x1]  ;;  %v85_v10 = vld [vmem:[#allocation6 + $0x1c] sm:$0x1]  ;;  %v86_v11 = vld [vmem:[#allocation6 + $0x20] sm:$0x1] }
  0x46   :  { %v87_v12 = vld [vmem:[#allocation6 + $0x24] sm:$0x1]  ;;  %v88_v13 = vld [vmem:[#allocation6 + $0x28] sm:$0x1]  ;;  %v89_v15 = vld [vmem:[#allocation6 + $0x2c] sm:$0x1] }
  0x47   :  { %v90_v16 = vld [vmem:[#allocation6 + $0x30] sm:$0x1]  ;;  %v91_v17 = vld [vmem:[#allocation6 + $0x34] sm:$0x1]  ;;  %v92_v18 = vld [vmem:[#allocation6 + $0x38] sm:$0x1] }
  0x48   :  { %778 = vmatpush3.bf16.msra.mxu0 %v804_v2  ;;  %v94_v14 = vstv %s77_s20  ;;  %v93_v19 = vld [vmem:[#allocation6 + $0x3c] sm:$0x1]  ;;  %v112_v20 = vld [vmem:[#allocation6 + $0x1] sm:$0x1]  ;;  %v113_v25 = vld [vmem:[#allocation6 + $0x5] sm:$0x1]  ;;  %v128_v34 = vstv %s749_s4 }
  0x49   :  { %v95_v21 = vmul.f32 %v94_v14, %v78_v3  ;;  %v96_v22 = vmul.f32 %v94_v14, %v79_v4  ;;  %v97_v23 = vmul.f32 %v94_v14, %v80_v5  ;;  %v98_v24 = vmul.f32 %v94_v14, %v81_v6  ;;  %v114_v26 = vld [vmem:[#allocation6 + $0x9] sm:$0x1]  ;;  %v115_v27 = vld [vmem:[#allocation6 + $0xd] sm:$0x1]  ;;  %v116_v31 = vld [vmem:[#allocation6 + $0x11] sm:$0x1] }
  0x4a   :  { %v99_v28 = vmul.f32 %v94_v14, %v82_v7  ;;  %v100_v29 = vmul.f32 %v94_v14, %v83_v8  ;;  %v101_v30 = vmul.f32 %v94_v14, %v84_v9  ;;  %v117_v32 = vld [vmem:[#allocation6 + $0x15] sm:$0x1]  ;;  %v118_v33 = vld [vmem:[#allocation6 + $0x19] sm:$0x1]  ;;  %v102_v35 = vmul.f32 %v94_v14, %v85_v10  ;;  %v119_v39 = vld [vmem:[#allocation6 + $0x1d] sm:$0x1] }
  0x4b   :  { %v103_v36 = vmul.f32 %v94_v14, %v86_v11  ;;  %v104_v37 = vmul.f32 %v94_v14, %v87_v12  ;;  %v105_v38 = vmul.f32 %v94_v14, %v88_v13  ;;  %v120_v40 = vld [vmem:[#allocation6 + $0x21] sm:$0x1]  ;;  %s1022_s10 = sld [smem:[#allocation2 + $0x2]]  ;;  %v106_v41 = vmul.f32 %v94_v14, %v89_v15  ;;  %v121_v45 = vld [vmem:[#allocation6 + $0x25] sm:$0x1]  ;;  %s1025_s21 = sld [smem:[#allocation2 + $0x3]] }
  0x4c   :  { %v107_v42 = vmul.f32 %v94_v14, %v90_v16  ;;  %v108_v43 = vmul.f32 %v94_v14, %v91_v17  ;;  %v109_v44 = vmul.f32 %v94_v14, %v92_v18  ;;  %v122_v46 = vld [vmem:[#allocation6 + $0x29] sm:$0x1]  ;;  %v123_v47 = vld [vmem:[#allocation6 + $0x2d] sm:$0x1]  ;;  %v110_v48 = vmul.f32 %v94_v14, %v93_v19  ;;  %v124_v49 = vld [vmem:[#allocation6 + $0x31] sm:$0x1] }
  0x4d   :  { %v125_v50 = vld [vmem:[#allocation6 + $0x35] sm:$0x1]  ;;  %v126_v51 = vld [vmem:[#allocation6 + $0x39] sm:$0x1]  ;;  %v129_v52 = vmul.f32 %v128_v34, %v112_v20  ;;  %v130_v53 = vmul.f32 %v128_v34, %v113_v25  ;;  %v131_v54 = vmul.f32 %v128_v34, %v114_v26  ;;  %v127_v55 = vld [vmem:[#allocation6 + $0x3d] sm:$0x1]  ;;  %v132_v56 = vmul.f32 %v128_v34, %v115_v27 }
  0x4e   :  { %v133_v57 = vmul.f32 %v128_v34, %v116_v31  ;;  %v134_v58 = vmul.f32 %v128_v34, %v117_v32  ;;  %v135_v59 = vmul.f32 %v128_v34, %v118_v33  ;;  %v136_v60 = vmul.f32 %v128_v34, %v119_v39  ;;  %v162_v5 = vld [vmem:[#allocation6 + $0x2] sm:$0x1]  ;;  %v163_v6 = vld [vmem:[#allocation6 + $0x6] sm:$0x1]  ;;  %v164_v11 = vld [vmem:[#allocation6 + $0xa] sm:$0x1] }
  0x4f   :  { %v137_v61 = vmul.f32 %v128_v34, %v120_v40  ;;  %v138_v62 = vmul.f32 %v128_v34, %v121_v45  ;;  %v139_v63 = vmul.f32 %v128_v34, %v122_v46  ;;  %v140_v0 = vmul.f32 %v128_v34, %v123_v47  ;;  %v165_v12 = vld [vmem:[#allocation6 + $0xe] sm:$0x1]  ;;  %v166_v13 = vld [vmem:[#allocation6 + $0x12] sm:$0x1]  ;;  %v167_v18 = vld [vmem:[#allocation6 + $0x16] sm:$0x1] }
  0x50   :  { %v141_v2 = vmul.f32 %v128_v34, %v124_v49  ;;  %v142_v3 = vmul.f32 %v128_v34, %v125_v50  ;;  %v143_v4 = vmul.f32 %v128_v34, %v126_v51  ;;  %v144_v7 = vmul.f32 %v128_v34, %v127_v55  ;;  %v168_v19 = vld [vmem:[#allocation6 + $0x1a] sm:$0x1]  ;;  %v169_v20 = vld [vmem:[#allocation6 + $0x1e] sm:$0x1]  ;;  %v170_v31 = vld [vmem:[#allocation6 + $0x22] sm:$0x1] }
  0x51   :  { %v145_v8 = vadd.f32 %v129_v52, %v95_v21  ;;  %v146_v9 = vadd.f32 %v130_v53, %v96_v22  ;;  %v147_v10 = vadd.f32 %v131_v54, %v97_v23  ;;  %v148_v14 = vadd.f32 %v132_v56, %v98_v24  ;;  %v171_v32 = vld [vmem:[#allocation6 + $0x26] sm:$0x1]  ;;  %v172_v33 = vld [vmem:[#allocation6 + $0x2a] sm:$0x1]  ;;  %v173_v40 = vld [vmem:[#allocation6 + $0x2e] sm:$0x1] }
  0x52   :  { %v149_v15 = vadd.f32 %v133_v57, %v99_v28  ;;  %v150_v16 = vadd.f32 %v134_v58, %v100_v29  ;;  %v151_v17 = vadd.f32 %v135_v59, %v101_v30  ;;  %v152_v25 = vadd.f32 %v136_v60, %v102_v35  ;;  %v174_v45 = vld [vmem:[#allocation6 + $0x32] sm:$0x1]  ;;  %v175_v29 = vld [vmem:[#allocation6 + $0x36] sm:$0x1]  ;;  %v176_v30 = vld [vmem:[#allocation6 + $0x3a] sm:$0x1] }
  0x53   :  { %v153_v26 = vadd.f32 %v137_v61, %v103_v36  ;;  %v154_v27 = vadd.f32 %v138_v62, %v104_v37  ;;  %v178_v21 = vstv %s1022_s10  ;;  %v155_v22 = vadd.f32 %v139_v63, %v105_v38  ;;  %v177_v46 = vld [vmem:[#allocation6 + $0x3e] sm:$0x1]  ;;  %v212_v57 = vld [vmem:[#allocation6 + $0x3] sm:$0x1]  ;;  %v213_v62 = vld [vmem:[#allocation6 + $0x7] sm:$0x1] }
  0x54   :  { %v156_v23 = vadd.f32 %v140_v0, %v106_v41  ;;  %v157_v34 = vadd.f32 %v141_v2, %v107_v42  ;;  %v158_v39 = vadd.f32 %v142_v3, %v108_v43  ;;  %v159_v24 = vadd.f32 %v143_v4, %v109_v44  ;;  %v214_v63 = vld [vmem:[#allocation6 + $0xb] sm:$0x1]  ;;  %v215_v0 = vld [vmem:[#allocation6 + $0xf] sm:$0x1] }
  0x55   :  { %v160_v28 = vadd.f32 %v144_v7, %v110_v48  ;;  %v179_v35 = vmul.f32 %v178_v21, %v162_v5  ;;  %v180_v36 = vmul.f32 %v178_v21, %v163_v6  ;;  %v181_v37 = vmul.f32 %v178_v21, %v164_v11  ;;  %v216_v6 = vld [vmem:[#allocation6 + $0x13] sm:$0x1]  ;;  %v217_v7 = vld [vmem:[#allocation6 + $0x17] sm:$0x1]  ;;  %v218_v11 = vld [vmem:[#allocation6 + $0x1b] sm:$0x1] }
  0x56   :  { %v182_v47 = vmul.f32 %v178_v21, %v165_v12  ;;  %v183_v49 = vmul.f32 %v178_v21, %v166_v13  ;;  %v184_v50 = vmul.f32 %v178_v21, %v167_v18  ;;  %v185_v51 = vmul.f32 %v178_v21, %v168_v19  ;;  %v220_v18 = vld [vmem:[#allocation6 + $0x23] sm:$0x1]  ;;  %v223_v19 = vld [vmem:[#allocation6 + $0x2f] sm:$0x1] }
  0x57   :  { %v186_v38 = vmul.f32 %v178_v21, %v169_v20  ;;  %v187_v41 = vmul.f32 %v178_v21, %v170_v31  ;;  %v188_v42 = vmul.f32 %v178_v21, %v171_v32  ;;  %v189_v43 = vmul.f32 %v178_v21, %v172_v33  ;;  %v224_v20 = vld [vmem:[#allocation6 + $0x33] sm:$0x1] }
  0x58   :  { %v190_v52 = vmul.f32 %v178_v21, %v173_v40  ;;  %v191_v53 = vmul.f32 %v178_v21, %v174_v45  ;;  %v192_v54 = vmul.f32 %v178_v21, %v175_v29  ;;  %v193_v55 = vmul.f32 %v178_v21, %v176_v30  ;;  %v226_v40 = vld [vmem:[#allocation6 + $0x3b] sm:$0x1] }
  0x59   :  { %v194_v44 = vmul.f32 %v178_v21, %v177_v46  ;;  %v195_v48 = vadd.f32 %v179_v35, %v145_v8  ;;  %v196_v56 = vadd.f32 %v180_v36, %v146_v9  ;;  %v197_v58 = vadd.f32 %v181_v37, %v147_v10  ;;  %v219_v9 = vld [vmem:[#allocation6 + $0x1f] sm:$0x1]  ;;  %v221_v10 = vld [vmem:[#allocation6 + $0x27] sm:$0x1] }
  0x5a   :  { %v198_v59 = vadd.f32 %v182_v47, %v148_v14  ;;  %v199_v60 = vadd.f32 %v183_v49, %v149_v15  ;;  %v200_v61 = vadd.f32 %v184_v50, %v150_v16  ;;  %v201_v2 = vadd.f32 %v185_v51, %v151_v17  ;;  %v222_v16 = vld [vmem:[#allocation6 + $0x2b] sm:$0x1] }
  0x5b   :  { %v202_v3 = vadd.f32 %v186_v38, %v152_v25  ;;  %v203_v4 = vadd.f32 %v187_v41, %v153_v26  ;;  %v204_v5 = vadd.f32 %v188_v42, %v154_v27  ;;  %v205_v12 = vadd.f32 %v189_v43, %v155_v22  ;;  %v225_v27 = vld [vmem:[#allocation6 + $0x37] sm:$0x1]  ;;  %v227_v22 = vld [vmem:[#allocation6 + $0x3f] sm:$0x1] }
  0x5c   :  { %v206_v13 = vadd.f32 %v190_v52, %v156_v23  ;;  %v207_v8 = vadd.f32 %v191_v53, %v157_v34  ;;  %v228_v14 = vstv %s1025_s21  ;;  %v208_v15 = vadd.f32 %v192_v54, %v158_v39 }
  0x5d   :  { %v230_v31 = vmul.f32 %v228_v14, %v213_v62  ;;  %v231_v32 = vmul.f32 %v228_v14, %v214_v63  ;;  %v232_v17 = vmul.f32 %v228_v14, %v215_v0  ;;  %v209_v25 = vadd.f32 %v193_v55, %v159_v24 }
  0x5e   :  { %v210_v26 = vadd.f32 %v194_v44, %v160_v28  ;;  %v229_v33 = vmul.f32 %v228_v14, %v212_v57  ;;  %v233_v21 = vmul.f32 %v228_v14, %v216_v6  ;;  %v234_v23 = vmul.f32 %v228_v14, %v217_v7 }
  0x5f   :  { %v235_v34 = vmul.f32 %v228_v14, %v218_v11  ;;  %v236_v45 = vmul.f32 %v228_v14, %v219_v9  ;;  %v237_v29 = vmul.f32 %v228_v14, %v220_v18  ;;  %v238_v30 = vmul.f32 %v228_v14, %v221_v10 }
  0x60   :  { %v239_v46 = vmul.f32 %v228_v14, %v222_v16  ;;  %v240_v39 = vmul.f32 %v228_v14, %v223_v19  ;;  %v241_v35 = vmul.f32 %v228_v14, %v224_v20  ;;  %v242_v36 = vmul.f32 %v228_v14, %v225_v27 }
  0x61   :  { %v246_v37 = vadd.f32 %v230_v31, %v196_v56  ;;  %v247_v47 = vadd.f32 %v231_v32, %v197_v58  ;;  %v248_v49 = vadd.f32 %v232_v17, %v198_v59  ;;  %v243_v50 = vmul.f32 %v228_v14, %v226_v40 }
  0x62   :  { %v244_v24 = vmul.f32 %v228_v14, %v227_v22  ;;  %v245_v28 = vadd.f32 %v229_v33, %v195_v48  ;;  %v249_v51 = vadd.f32 %v233_v21, %v199_v60  ;;  %v250_v38 = vadd.f32 %v234_v23, %v200_v61 }
  0x63   :  { %v251_v41 = vadd.f32 %v235_v34, %v201_v2  ;;  %v252_v42 = vadd.f32 %v236_v45, %v202_v3  ;;  %v253_v43 = vadd.f32 %v237_v29, %v203_v4  ;;  %v254_v52 = vadd.f32 %v238_v30, %v204_v5 }
  0x64   :  { %v255_v53 = vadd.f32 %v239_v46, %v205_v12  ;;  %v256_v54 = vadd.f32 %v240_v39, %v206_v13  ;;  %v257_v55 = vadd.f32 %v241_v35, %v207_v8  ;;  %vm321_vm1 = vcmask 1041409  }
  0x65   :  { %v258_v44 = vadd.f32 %v242_v36, %v208_v15  ;;  %v262_v57 = vpack.c.bf16 %v246_v37, %v246_v37  ;;  %v263_v62 = vpack.c.bf16 %v247_v47, %v247_v47  ;;  %v264_v63 = vpack.c.bf16 %v248_v49, %v248_v49 }
  0x66   :  { %vm324_vm2 = vcmask 1042434   ;;  %v259_v56 = vadd.f32 %v243_v50, %v209_v25  ;;  %v260_v58 = vadd.f32 %v244_v24, %v210_v26  ;;  %v261_v59 = vpack.c.bf16 %v245_v28, %v245_v28 }
  0x67   :  { %v265_v0 = vpack.c.bf16 %v249_v51, %v249_v51  ;;  %vm327_vm3 = vcmask 1043459   ;;  %v266_v48 = vpack.c.bf16 %v250_v38, %v250_v38  ;;  %v267_v60 = vpack.c.bf16 %v251_v41, %v251_v41 }
  0x68   :  { %v268_v61 = vpack.c.bf16 %v252_v42, %v252_v42  ;;  %v269_v2 = vpack.c.bf16 %v253_v43, %v253_v43  ;;  %v270_v3 = vpack.c.bf16 %v254_v52, %v254_v52  ;;  %v271_v4 = vpack.c.bf16 %v255_v53, %v255_v53 }
  0x69   :  { %v272_v5 = vpack.c.bf16 %v256_v54, %v256_v54  ;;  %v273_v6 = vpack.c.bf16 %v257_v55, %v257_v55  ;;  %v274_v7 = vpack.c.bf16 %v258_v44, %v258_v44  ;;  %v305_v11 = vunpack.c.l.b16 %v262_v57  ;;  %v805_v57 = vld [vmem:[#allocation9] sm:$0xff]  }
  0x6a   :  { %v306_v12 = vunpack.c.l.b16 %v263_v62  ;;  %v307_v13 = vunpack.c.l.b16 %v264_v63  ;;  %v275_v8 = vpack.c.bf16 %v259_v56, %v259_v56  ;;  %v276_v9 = vpack.c.bf16 %v260_v58, %v260_v58  ;;  %784 = vmatpush3.bf16.msra.mxu1 %v805_v57  ;;  %v806_v62 = vld [vmem:[#allocation9 + $0x8] sm:$0xff]   ;;  %v752_v63 = vld [vmem:[%s1155_s3] ss:$0 sm:$0xff]  ;;  %s922_s3 = smov [#allocation10]  }
  0x6b   :  { %v304_v18 = vunpack.c.l.b16 %v261_v59  ;;  %v308_v10 = vunpack.c.l.b16 %v265_v0  ;;  %v309_v14 = vunpack.c.l.b16 %v266_v48  ;;  %v310_v15 = vunpack.c.l.b16 %v267_v60  ;;  %785 = vmatprep.subr.bf16.mxu1 %v919_v1 }
  0x6c   :  { %v311_v16 = vunpack.c.l.b16 %v268_v61  ;;  %v312_v19 = vunpack.c.l.b16 %v269_v2  ;;  %v313_v20 = vunpack.c.l.b16 %v270_v3  ;;  %v314_v31 = vunpack.c.l.b16 %v271_v4 }
  0x6d   :  { %v315_v32 = vunpack.c.l.b16 %v272_v5  ;;  %v316_v17 = vunpack.c.l.b16 %v273_v6  ;;  %v317_v25 = vunpack.c.l.b16 %v274_v7  ;;  %v320_v26 = vrot.slane %v305_v11, 7  ;;  %v756_v6 = vld [vmem:[%s1157_s5] ss:$0 sm:$0xff]  ;;  %s735_s5 = sshll.u32 %s922_s3, 4  ;;  %s736_s5 = int_to_ptr.vmem [resolvable:$true] %s735_s5 }
  0x6e   :  { %v323_v27 = vrot.slane %v306_v12, 6  ;;  %v326_v33 = vrot.slane %v307_v13, 5  ;;  %v318_v21 = vunpack.c.l.b16 %v275_v8  ;;  %v319_v40 = vunpack.c.l.b16 %v276_v9  ;;  %786 = vmatpush3.bf16.msra.mxu1 %v806_v62  ;;  %v555_v62 = vld [vmem:[#allocation10 + $0x7] sm:$0x1]  ;;  %p888_p0 = scmp.lt.s32.totalorder %s736_s5, %s736_s5 }
  0x6f   :  { %v329_v22 = vrot.slane %v308_v10, 4  ;;  %vm330_vm4 = vcmask 1044484   ;;  %v322_v23 = vsel %vm321_vm1, %v320_v26, %v304_v18  ;;  %v332_v34 = vrot.slane %v309_v14, 3 }
  0x70   :  { %vm333_vm5 = vcmask 1045509   ;;  %v335_v45 = vrot.slane %v310_v15, 2  ;;  %v325_v29 = vsel %vm324_vm2, %v323_v27, %v322_v23  ;;  %v341_v30 = vrot.slane %v313_v20, 7 }
  0x71   :  { %v343_v46 = vrot.slane %v314_v31, 6  ;;  %v345_v39 = vrot.slane %v315_v32, 5  ;;  %v328_v35 = vsel %vm327_vm3, %v326_v33, %v325_v29  ;;  %vm336_vm6 = vcmask 1046534   ;;  %v540_v33 = vld [vmem:[#allocation10 + $0x2] sm:$0x1] }
  0x72   :  { %v347_v36 = vrot.slane %v316_v17, 4  ;;  %v331_v37 = vsel %vm330_vm4, %v329_v22, %v328_v35  ;;  %v338_v47 = vrot.slane %v311_v16, 1  ;;  %v342_v49 = vsel %vm321_vm1, %v341_v30, %v312_v19  ;;  %v534_v17 = vld [vmem:[#allocation10] sm:$0x1]  ;;  %v546_v30 = vld [vmem:[#allocation10 + $0x4] sm:$0x1] }
  0x73   :  { %v349_v50 = vrot.slane %v317_v25, 3  ;;  %v334_v24 = vsel %vm333_vm5, %v332_v34, %v331_v37  ;;  %vm339_vm7 = vcmask 1047559   ;;  %v344_v28 = vsel %vm324_vm2, %v343_v46, %v342_v49 }
  0x74   :  { %v351_v51 = vrot.slane %v318_v21, 2  ;;  %v337_v38 = vsel %vm336_vm6, %v335_v45, %v334_v24  ;;  %v346_v41 = vsel %vm327_vm3, %v345_v39, %v344_v28  ;;  %v353_v42 = vrot.slane %v319_v40, 1  ;;  %v537_v45 = vld [vmem:[#allocation10 + $0x1] sm:$0x1]  ;;  %v543_v39 = vld [vmem:[#allocation10 + $0x3] sm:$0x1] }
  0x75   :  { %v348_v43 = vsel %vm330_vm4, %v347_v36, %v346_v41  ;;  %v340_v52 = vsel %vm339_vm7, %v338_v47, %v337_v38  ;;  %vm368_vm8 = vcmask 261120   ;;  %v921_v2 = vmov 1966171168   ;;  %v549_v24 = vld [vmem:[#allocation10 + $0x5] sm:$0x1] }
  0x76   :  { %v350_v53 = vsel %vm333_vm5, %v349_v50, %v348_v43  ;;  %v484_v3 = vunpack.c.l.s4 %v921_v2  ;;  %v486_v4 = vlaneseq  ;;  %vm531_vm9 = vcmask 516096   ;;  %v552_v28 = vld [vmem:[#allocation10 + $0x6] sm:$0x1] }
  0x77   :  { %v352_v54 = vsel %vm336_vm6, %v351_v51, %v350_v53  ;;  %vm532_vm10 = vsmask.f32 256  ;;  %vm656_vm12 = vsmask.f32 7938 }
  0x78   :  { %v354_v55 = vsel %vm339_vm7, %v353_v42, %v352_v54  ;;  %v485_v5 = vunpack.c.0.s8 %v484_v3  ;;  %v487_v1 = vshrl.u32 %v486_v4, 7  ;;  %vm1050_vm11 = vmand %vm531_vm9, %vm532_vm10 }
  0x79   :  { %v355_v44 = vpack.c.b16 %v354_v55, %v340_v52  ;;  %vm1073_vm13 = vmand %vm531_vm9, %vm656_vm12 }
  0x7a   :  { %v488_v9 = vsub.s32 %v485_v5, %v487_v1 }
  0x7b   :  { %780 = vmatmul.mubr.msk.bf16.vlgmr.msra.gmra.mrb[0].mxu0 %vm368_vm8, %v355_v44 }
 0x14e   :  { %v406_v56 = vpop.f32.mrb[0].mxu0 }
 0x14f   :  { %v781_v58 = vpop.f32.mrb[1].mxu0  ;;  %v407_v0 = vadd.f32 %v752_v63, %v406_v56 }
 0x150   :  { %v409_v59 = vpop.f32.mrb[2].mxu0 }
 0x151   :  { %v410_v48 = vadd.f32 %v752_v63, %v409_v59  ;;  %v782_v60 = vpop.f32.mrb[3].mxu0 }
 0x153   :  { %v413_v61 = vpack.c.bf16 %v410_v48, %v407_v0 }
 0x155   :  { %788 = vmatmul.mubr.msk.bf16.vlgmr.msra.gmra.mrb[0].mxu1 %vm368_vm8, %v413_v61 }
 0x228   :  { %v474_v7 = vpop.f32.mrb[0].mxu1 }
 0x229   :  { %v789_v11 = vpop.f32.mrb[1].mxu1  ;;  %v475_v13 = vadd.f32 %v756_v6, %v474_v7 }
 0x22a   :  { %v477_v12 = vpop.f32.mrb[2].mxu1 }
 0x22b   :  { %v478_v8 = vadd.f32 %v756_v6, %v477_v12  ;;  %v790_v18 = vpop.f32.mrb[3].mxu1 }
 0x22d   :  { %v481_v10 = vpack.c.bf16 %v478_v8, %v475_v13  ;;  %v764_v14 = vpack.c.bf16 %v478_v8, %v478_v8 }
 0x22f   :  { %v489_v15 = vrot.slane %v481_v10, %v488_v9  ;;  %v614_v16 = vrot.slane %v764_v14, %v488_v9 }
 0x231   :  { %v490_v19 = vcombine.high %v489_v15, %v489_v15  ;;  %v497_v20 = vrot.slane %v489_v15, %v488_v9  ;;  %v622_v31 = vrot.slane %v614_v16, %v488_v9  ;;  %v615_v25 = vcombine.high %v614_v16, %v614_v16 }
 0x233   :  { %v760_v26 = vpack.i.b16 %v497_v20, %v497_v20  ;;  %v504_v27 = vrot.slane %v490_v19, %v488_v9  ;;  %v508_v21 = vunpack.i.h.s16 %v497_v20  ;;  %v505_v40 = vcombine.high %v497_v20, %v497_v20 }
 0x234   :  { %v633_v34 = vunpack.i.h.s16 %v622_v31  ;;  %v765_v49 = vpack.i.b16 %v622_v31, %v622_v31  ;;  %v629_v51 = vrot.slane %v615_v25, %v488_v9  ;;  %v630_v55 = vcombine.high %v622_v31, %v622_v31  ;;  %v583_v25 = vld [vmem:[#allocation10 + $0x8] sm:$0x1] }
 0x235   :  { %558 = vrot.lane.b32.xlu0 %v760_v26, %s915_s9  ;;  %v535_v22 = vsel %vm1050_vm11, %v760_v26, %v534_v17  ;;  %v761_v23 = vpack.i.b16 %v504_v27, %v504_v27  ;;  %v510_v29 = vunpack.i.h.s16 %v504_v27  ;;  %v516_v46 = vpack.i.b16 %v508_v21, %v508_v21 }
 0x236   :  { %536 = vst [vmem:[#allocation10] sm:$0x1] %v535_v22  ;;  %v762_v35 = vpack.i.b16 %v505_v40, %v505_v40  ;;  %v512_v36 = vunpack.i.h.s16 %v505_v40  ;;  %v506_v37 = vcombine.high %v504_v27, %v504_v27  ;;  %v641_v52 = vpack.i.b16 %v633_v34, %v633_v34  ;;  %v589_v27 = vld [vmem:[#allocation10 + $0xa] sm:$0x1]  ;;  %v586_v34 = vld [vmem:[#allocation10 + $0x9] sm:$0x1] }
 0x237   :  { %562 = vrot.lane.b32.xlu1 %v761_v23, %s915_s9  ;;  %v541_v47 = vsel %vm1050_vm11, %v761_v23, %v540_v33  ;;  %v518_v50 = vpack.i.b16 %v510_v29, %v510_v29  ;;  %v538_v38 = vsel %vm1050_vm11, %v516_v46, %v537_v45  ;;  %v635_v58 = vunpack.i.h.s16 %v629_v51  ;;  %v592_v29 = vld [vmem:[#allocation10 + $0xb] sm:$0x1] }
 0x238   :  { %542 = vst [vmem:[#allocation10 + $0x2] sm:$0x1] %v541_v47  ;;  %v547_v41 = vsel %vm1050_vm11, %v762_v35, %v546_v30  ;;  %v520_v42 = vpack.i.b16 %v512_v36, %v512_v36  ;;  %v763_v43 = vpack.i.b16 %v506_v37, %v506_v37  ;;  %539 = vst [vmem:[#allocation10 + $0x1] sm:$0x1] %v538_v38  ;;  %v514_v54 = vunpack.i.h.s16 %v506_v37  ;;  %v595_v36 = vld [vmem:[#allocation10 + $0xc] sm:$0x1] }
 0x239   :  { %682 = vrot.lane.b32.xlu0 %v765_v49, %s915_s9  ;;  %v544_v53 = vsel %vm1050_vm11, %v518_v50, %v543_v39  ;;  %548 = vst [vmem:[#allocation10 + $0x4] sm:$0x1] %v547_v41  ;;  %v631_v59 = vcombine.high %v629_v51, %v629_v51  ;;  %v637_v60 = vunpack.i.h.s16 %v630_v55  ;;  %v766_v2 = vpack.i.b16 %v629_v51, %v629_v51  ;;  %v604_v41 = vld [vmem:[#allocation10 + $0xf] sm:$0x1] }
 0x23a   :  { %545 = vst [vmem:[#allocation10 + $0x3] sm:$0x1] %v544_v53  ;;  %v550_v44 = vsel %vm1050_vm11, %v520_v42, %v549_v24  ;;  %v553_v57 = vsel %vm1050_vm11, %v763_v43, %v552_v28  ;;  %v522_v56 = vpack.i.b16 %v514_v54, %v514_v54  ;;  %v767_v4 = vpack.i.b16 %v630_v55, %v630_v55  ;;  %v601_v28 = vld [vmem:[#allocation10 + $0xe] sm:$0x1] }
 0x23b   :  { %684 = vrot.lane.b32.xlu1 %v641_v52, %s915_s9  ;;  %551 = vst [vmem:[#allocation10 + $0x5] sm:$0x1] %v550_v44  ;;  %554 = vst [vmem:[#allocation10 + $0x6] sm:$0x1] %v553_v57  ;;  %v643_v6 = vpack.i.b16 %v635_v58, %v635_v58  ;;  %v639_v11 = vunpack.i.h.s16 %v631_v59  ;;  %v645_v9 = vpack.i.b16 %v637_v60, %v637_v60 }
 0x23c   :  { %v556_v48 = vsel %vm1050_vm11, %v522_v56, %v555_v62  ;;  %v768_v18 = vpack.i.b16 %v631_v59, %v631_v59 }
 0x23d   :  { %v658_v0 = vld [vmem:[#allocation10] sm:$0x1]  ;;  %560 = vrot.lane.b32.xlu0 %v516_v46, %s915_s9  ;;  %557 = vst [vmem:[#allocation10 + $0x7] sm:$0x1] %v556_v48  ;;  %v647_v20 = vpack.i.b16 %v639_v11, %v639_v11 }
 0x23e   :  { %v659_v61 = vsel %vm1073_vm13, %v765_v49, %v658_v0  ;;  %v598_v49 = vld [vmem:[#allocation10 + $0xd] sm:$0x1] }
 0x23f   :  { %660 = vst [vmem:[#allocation10] sm:$0x1] %v659_v61  ;;  %564 = vrot.lane.b32.xlu1 %v518_v50, %s915_s9  ;;  %v664_v3 = vld [vmem:[#allocation10 + $0x2] sm:$0x1]  ;;  %v661_v5 = vld [vmem:[#allocation10 + $0x1] sm:$0x1] }
 0x240   :  { %v665_v1 = vsel %vm1073_vm13, %v766_v2, %v664_v3  ;;  %v670_v7 = vld [vmem:[#allocation10 + $0x4] sm:$0x1]  ;;  %v662_v12 = vsel %vm1073_vm13, %v641_v52, %v661_v5 }
 0x241   :  { %566 = vrot.lane.b32.xlu0 %v762_v35, %s915_s9  ;;  %666 = vst [vmem:[#allocation10 + $0x2] sm:$0x1] %v665_v1  ;;  %v667_v13 = vld [vmem:[#allocation10 + $0x3] sm:$0x1]  ;;  %v671_v8 = vsel %vm1073_vm13, %v767_v4, %v670_v7  ;;  %663 = vst [vmem:[#allocation10 + $0x1] sm:$0x1] %v662_v12 }
 0x242   :  { %v668_v10 = vsel %vm1073_vm13, %v643_v6, %v667_v13  ;;  %672 = vst [vmem:[#allocation10 + $0x4] sm:$0x1] %v671_v8  ;;  %v673_v14 = vld [vmem:[#allocation10 + $0x5] sm:$0x1]  ;;  %v676_v15 = vld [vmem:[#allocation10 + $0x6] sm:$0x1] }
 0x243   :  { %568 = vrot.lane.b32.xlu1 %v520_v42, %s915_s9  ;;  %669 = vst [vmem:[#allocation10 + $0x3] sm:$0x1] %v668_v10  ;;  %v674_v16 = vsel %vm1073_vm13, %v645_v9, %v673_v14  ;;  %v677_v19 = vsel %vm1073_vm13, %v768_v18, %v676_v15 }
 0x244   :  { %675 = vst [vmem:[#allocation10 + $0x5] sm:$0x1] %v674_v16  ;;  %678 = vst [vmem:[#allocation10 + $0x6] sm:$0x1] %v677_v19  ;;  %v679_v31 = vld [vmem:[#allocation10 + $0x7] sm:$0x1] }
 0x245   :  { %570 = vrot.lane.b32.xlu0 %v763_v43, %s915_s9  ;;  %v680_v17 = vsel %vm1073_vm13, %v647_v20, %v679_v31 }
 0x246   :  { %681 = vst [vmem:[#allocation10 + $0x7] sm:$0x1] %v680_v17 }
 0x247   :  { %572 = vrot.lane.b32.xlu1 %v522_v56, %s915_s9 }
 0x249   :  { %686 = vrot.lane.b32.xlu0 %v766_v2, %s915_s9 }
 0x24b   :  { %688 = vrot.lane.b32.xlu1 %v643_v6, %s915_s9 }
 0x24d   :  { %690 = vrot.lane.b32.xlu0 %v767_v4, %s915_s9 }
 0x24f   :  { %692 = vrot.lane.b32.xlu1 %v645_v9, %s915_s9 }
 0x251   :  { %694 = vrot.lane.b32.xlu0 %v768_v18, %s915_s9 }
 0x253   :  { %696 = vrot.lane.b32.xlu1 %v647_v20, %s915_s9  ;;  %s883_s9 = scalar_lea.vmem %s736_s5, 256 }
 0x254   :  { %p884_p13 = scmp.ne.s32.totalorder %s736_s5, %s883_s9  ;;  %p889_p1 = scmp.lt.s32.totalorder %s883_s9, %s883_s9 }
 0x256   :  { %p890_p2 = por %p889_p1, %p888_p0 }
 0x258   :  { %p891_p3 = pnand %p890_p2, %p884_p13 }
 0x2a7   :  { %v559_v26 = vpop.permute.xlu0 %558 }
 0x2a8   :  { %v584_v33 = vsel %vm1050_vm11, %v559_v26, %v583_v25 }
 0x2a9   :  { %585 = vst [vmem:[#allocation10 + $0x8] sm:$0x1] %v584_v33  ;;  %v563_v21 = vpop.permute.xlu1 %562 }
 0x2aa   :  { %v590_v40 = vsel %vm1050_vm11, %v563_v21, %v589_v27 }
 0x2ab   :  { %591 = vst [vmem:[#allocation10 + $0xa] sm:$0x1] %v590_v40  ;;  %v683_v22 = vpop.permute.xlu0 %682 }
 0x2ad   :  { %v685_v23 = vpop.permute.xlu1 %684 }
 0x2af   :  { %v561_v45 = vpop.permute.xlu0 %560 }
 0x2b0   :  { %v706_v30 = vld [vmem:[#allocation10 + $0x8] sm:$0x1]  ;;  %v587_v46 = vsel %vm1050_vm11, %v561_v45, %v586_v34 }
 0x2b1   :  { %v707_v39 = vsel %vm1073_vm13, %v683_v22, %v706_v30  ;;  %588 = vst [vmem:[#allocation10 + $0x9] sm:$0x1] %v587_v46  ;;  %v565_v35 = vpop.permute.xlu1 %564 }
 0x2b2   :  { %708 = vst [vmem:[#allocation10 + $0x8] sm:$0x1] %v707_v39  ;;  %v593_v37 = vsel %vm1050_vm11, %v565_v35, %v592_v29  ;;  %v712_v55 = vld [vmem:[#allocation10 + $0xa] sm:$0x1] }
 0x2b3   :  { %594 = vst [vmem:[#allocation10 + $0xb] sm:$0x1] %v593_v37  ;;  %v567_v47 = vpop.permute.xlu0 %566 }
 0x2b4   :  { %v596_v50 = vsel %vm1050_vm11, %v567_v47, %v595_v36 }
 0x2b5   :  { %597 = vst [vmem:[#allocation10 + $0xc] sm:$0x1] %v596_v50  ;;  %v569_v24 = vpop.permute.xlu1 %568 }
 0x2b6   :  { %v599_v51 = vsel %vm1050_vm11, %v569_v24, %v598_v49 }
 0x2b7   :  { %600 = vst [vmem:[#allocation10 + $0xd] sm:$0x1] %v599_v51  ;;  %v571_v38 = vpop.permute.xlu0 %570 }
 0x2b8   :  { %v709_v42 = vld [vmem:[#allocation10 + $0x9] sm:$0x1]  ;;  %v602_v43 = vsel %vm1050_vm11, %v571_v38, %v601_v28 }
 0x2b9   :  { %v710_v52 = vsel %vm1073_vm13, %v685_v23, %v709_v42  ;;  %603 = vst [vmem:[#allocation10 + $0xe] sm:$0x1] %v602_v43  ;;  %v573_v53 = vpop.permute.xlu1 %572 }
 0x2ba   :  { %711 = vst [vmem:[#allocation10 + $0x9] sm:$0x1] %v710_v52  ;;  %v605_v54 = vsel %vm1050_vm11, %v573_v53, %v604_v41  ;;  %v715_v62 = vld [vmem:[#allocation10 + $0xb] sm:$0x1] }
 0x2bb   :  { %606 = vst [vmem:[#allocation10 + $0xf] sm:$0x1] %v605_v54  ;;  %v687_v44 = vpop.permute.xlu0 %686 }
 0x2bc   :  { %v713_v57 = vsel %vm1073_vm13, %v687_v44, %v712_v55  ;;  %v718_v59 = vld [vmem:[#allocation10 + $0xc] sm:$0x1] }
 0x2bd   :  { %714 = vst [vmem:[#allocation10 + $0xa] sm:$0x1] %v713_v57  ;;  %v689_v56 = vpop.permute.xlu1 %688 }
 0x2be   :  { %v716_v58 = vsel %vm1073_vm13, %v689_v56, %v715_v62  ;;  %v721_v32 = vld [vmem:[#allocation10 + $0xd] sm:$0x1] }
 0x2bf   :  { %717 = vst [vmem:[#allocation10 + $0xb] sm:$0x1] %v716_v58  ;;  %v691_v0 = vpop.permute.xlu0 %690 }
 0x2c0   :  { %v719_v48 = vsel %vm1073_vm13, %v691_v0, %v718_v59  ;;  %v724_v2 = vld [vmem:[#allocation10 + $0xe] sm:$0x1] }
 0x2c1   :  { %720 = vst [vmem:[#allocation10 + $0xc] sm:$0x1] %v719_v48  ;;  %v693_v60 = vpop.permute.xlu1 %692 }
 0x2c2   :  { %v722_v61 = vsel %vm1073_vm13, %v693_v60, %v721_v32  ;;  %v727_v5 = vld [vmem:[#allocation10 + $0xf] sm:$0x1] }
 0x2c3   :  { %723 = vst [vmem:[#allocation10 + $0xd] sm:$0x1] %v722_v61  ;;  %v695_v3 = vpop.permute.xlu0 %694 }
 0x2c4   :  { %v725_v4 = vsel %vm1073_vm13, %v695_v3, %v724_v2 }
 0x2c5   :  { %726 = vst [vmem:[#allocation10 + $0xe] sm:$0x1] %v725_v4  ;;  %v697_v1 = vpop.permute.xlu1 %696 }
 0x2c6   :  { %v728_v6 = vsel %vm1073_vm13, %v697_v1, %v727_v5 }
 0x2c7   :  { %729 = vst [vmem:[#allocation10 + $0xf] sm:$0x1] %v728_v6 }
 0x2c8   :  { %894 = shalt.err (!%p891_p3)
}
 0x2c9   :  { %s895_s28 = scalar_lea.hbm %s1158_s6, 256 }
 0x2ca   :  { %p896_p4 = scmp.ne.s32.totalorder %s1158_s6, %s895_s28  ;;  %p899_p5 = scmp.lt.u32.totalorder %s895_s28, %s1158_s6 }
 0x2cc   :  { %p901_p6 = pnand %p899_p5, %p896_p4 }
 0x2ce   :  { %904 = shalt.err (!%p901_p6)
}
 0x2cf   :  { %s923_s8 = smov 16   ;;  %s924_s11 = smov 1  }
 0x2d0   :  { %741 = dma.vmem_to_hbm [thread:$0]  %s736_s5, 256, %s1158_s6, [#allocation4], %s923_s8, %s923_s8, %s924_s11  }
 0x2d1   :  { %911 = dma.done.wait [#allocation4], 256  }
 0x2d2   :  { %912 = vsyncadd [#allocation4], 4294967040 }
 0x2d3   :  { %745 = vsyncpa [#allocation3], 1 }
 0x2d4   :  { %746 = vsyncpa [#allocation8], 1 }
 0x2d5   :  { %747 = vsyncpa [#allocation4], 1 }
 0x2d6   :  { %748 = vsyncpa [#allocation5], 1 }

</bundles_post_ra>
